<compile_context>
chip_gen: v5e
topology: v5e:2x2
jax: 0.10.0
libtpu: 0.0.40
codegen_flags: <defaults>
</compile_context>

<pallas_src>
import functools
import math

import jax
import jax.numpy as jnp
from jax.experimental import pallas as pl
from jax.experimental.pallas import tpu as pltpu


def _round_up(n, m):
    return ((n + m - 1) // m) * m


def _cdiv(a, b):
    return (a + b - 1) // b


def _fa_tanh_kernel(x_ref, w1_ref, w2_ref, out_ref, *, inv_sqrt_h):
    # x_ref: [TB, F_in], w1_ref: [H, F_in], w2_ref: [1, H], out_ref: [1, TB]
    #
    # Layer 1: hidden^T = tanh(W1 @ X^T).  Contracting the trailing axis of
    # both operands is the MXU-native transposed-RHS matmul (flash-attention's
    # q @ k^T form), so the large X tile is consumed in its natural [TB, F_in]
    # layout -- no explicit transpose / XLU traffic that scales with TB*F_in.
    hidden_t = jnp.tanh(
        jax.lax.dot_general(
            w1_ref[...],
            x_ref[...],
            dimension_numbers=(((1,), (1,)), ((), ())),
            preferred_element_type=jnp.float32,
        )
    )  # [H, TB] f32, batch on the lane axis

    # Layer 2: fold 1/sqrt(H) into the tiny W2 row (H elements per step), then
    # one canonical [1,H] x [H,TB] MXU matmul streams hidden_t through the
    # (otherwise idle) MXU once and yields the lane-dense [1, TB] output row
    # directly -> unmasked full-lane stores.
    w2_scaled = w2_ref[...].astype(jnp.float32) * inv_sqrt_h  # [1, H]
    pred_row = jax.lax.dot_general(
        w2_scaled,
        hidden_t,
        dimension_numbers=(((1,), (0,)), ((), ())),
        preferred_element_type=jnp.float32,
    )  # [1, TB]
    out_ref[...] = pred_row.astype(out_ref.dtype)


def two_layer_fa_tanh_forward(x, w1, w2, *, target_tile_bytes=4 * 1024 * 1024):
    """x: [B, F_in]; w1: [H, F_in]; w2: [1, H]  ->  prediction [B, 1] f32."""
    B, F_in = x.shape
    H, f_in_w = w1.shape
    assert f_in_w == F_in and w2.shape == (1, H)

    # Keep weights in the same dtype as X (supports a bf16 X from the producer
    # without an extra wrapper pass over the large input; accumulation is f32).
    if w1.dtype != x.dtype:
        w1 = w1.astype(x.dtype)
    if w2.dtype != x.dtype:
        w2 = w2.astype(x.dtype)
    itemsize = jnp.dtype(x.dtype).itemsize

    # ---- VMEM budget: derive from the chip (v7x: 64 MiB, v5e/v6e: 128 MiB). ----
    try:
        vmem_cap = int(pltpu.get_tpu_info().vmem_capacity_bytes)
    except Exception:
        vmem_cap = 64 * 1024 * 1024  # conservative fallback (v7x-sized)
    vmem_limit = min((vmem_cap * 3) // 4, 112 * 1024 * 1024)

    # Per batch-row bytes of the pipelined working set:
    #   double-buffered X tile + f32 hidden^T + double-buffered [1, tb] out row
    bytes_per_row = 2 * F_in * itemsize + H * 4 + 2 * 8 * 4
    resident_bytes = 2 * (H * F_in + H) * itemsize + (1 << 20)  # weights + slack
    rows_vmem_cap = max(128, (vmem_limit - resident_bytes) // bytes_per_row)

    # ---- Tile-size selection. ----
    b128 = _round_up(max(B, 1), 128)          # pad batch only to a lane multiple
    total_x_bytes = b128 * F_in * itemsize
    # Rows per step carrying ~target_tile_bytes of X (amortize per-step overhead).
    rows_target = max(128, target_tile_bytes // (F_in * itemsize))
    rows_max = min(rows_target, rows_vmem_cap)

    n_steps = _cdiv(b128, rows_max)
    # Megacore: prefer >= 2-4 grid steps on big batches (v7x has 2 TCs) as long
    # as each step still moves >= ~1 MiB of X (so per-step overhead stays hidden).
    n_mega = max(1, min(4, total_x_bytes // (1024 * 1024)))
    n_steps = max(n_steps, n_mega)
    n_steps = min(n_steps, b128 // 128)       # never shrink a tile below 128 rows

    tb = _round_up(_cdiv(b128, n_steps), 128)
    n_steps = _cdiv(b128, tb)
    b_pad = n_steps * tb                      # waste < 128 rows per step

    if b_pad != B:
        # Zero rows: tanh(0) = 0 -> prediction 0, sliced off below.
        x = jnp.pad(x, ((0, b_pad - B), (0, 0)))

    inv_sqrt_h = 1.0 / math.sqrt(float(H))
    kernel = functools.partial(_fa_tanh_kernel, inv_sqrt_h=inv_sqrt_h)

    out_row = pl.pallas_call(
        kernel,
        out_shape=jax.ShapeDtypeStruct((1, b_pad), jnp.float32),
        grid_spec=pltpu.PrefetchScalarGridSpec(
            num_scalar_prefetch=0,
            grid=(n_steps,),
            in_specs=[
                pl.BlockSpec((tb, F_in), lambda i: (i, 0)),   # X tile (pipelined)
                pl.BlockSpec((H, F_in), lambda i: (0, 0)),    # W1 (resident)
                pl.BlockSpec((1, H), lambda i: (0, 0)),       # W2 row (resident)
            ],
            out_specs=pl.BlockSpec((1, tb), lambda i: (0, i)),
        ),
        compiler_params=pltpu.CompilerParams(
            # Batch tiles are independent -> shard grid steps across both TCs on
            # v7x; harmless no-op on single-TC v5e/v6e.
            dimension_semantics=("parallel",),
            # Raised above every generation's default scoped limit (16/32 MiB)
            # while staying under v7x's 64 MiB physical VMEM; tile sizing above
            # is derived from the same budget.
            vmem_limit_bytes=int(vmem_limit),
        ),
    )(x, w1, w2)

    # Lane-dense [1, B_pad] row -> [B, 1] column (free layout plumbing outside).
    return out_row[0, :B].reshape(B, 1)


def reference_forward(x, w1, w2):
    xf = x.astype(jnp.float32)
    h = jnp.tanh(xf @ w1.astype(jnp.float32).T)
    return (h @ w2.astype(jnp.float32).T) / jnp.sqrt(
        jnp.asarray(w1.shape[0], jnp.float32)
    )


if __name__ == "__main__":
    # Small shapes consistent with the module: batch=8, input_features=16, hidden=32.
    # (At this demo size the whole problem fits one grid step; the adaptive
    # tiling above only engages for large batches.)
    batch, input_features, hidden_features = 8, 16, 32

    key = jax.random.PRNGKey(0)
    kx, k1, k2 = jax.random.split(key, 3)

    x = jax.random.normal(kx, (batch, input_features), dtype=jnp.float32)
    # Deterministic synthetic parameter init (module shapes: [H, F_in] and [1, H]).
    w1 = jax.random.normal(k1, (hidden_features, input_features), dtype=jnp.float32)
    w1 = w1 / jnp.sqrt(jnp.asarray(input_features, jnp.float32))
    w2 = jax.random.normal(k2, (1, hidden_features), dtype=jnp.float32)

    out = jax.block_until_ready(two_layer_fa_tanh_forward(x, w1, w2))

    ref = reference_forward(x, w1, w2)
    assert out.shape == (batch, 1)
    max_err = float(jnp.max(jnp.abs(out - ref)))
    assert jnp.allclose(out, ref, atol=1e-4, rtol=1e-4), max_err

    print("KERNEL_OK")
</pallas_src>

<mosaic_0001>
module attributes {stable_mosaic.version = 11 : i64} {
  func.func @_fa_tanh_kernel(%arg0: i32, %arg1: memref<128x16xf32, #tpu.memory_space<vmem>>, %arg2: memref<32x16xf32, #tpu.memory_space<vmem>>, %arg3: memref<1x32xf32, #tpu.memory_space<vmem>>, %arg4: memref<1x128xf32, #tpu.memory_space<vmem>>) attributes {dimension_semantics = [#tpu.dimension_semantics<parallel>], iteration_bounds = array<i64: 1>, scalar_prefetch = 0 : i64, scratch_operands = 0 : i64, tpu.core_type = #tpu.core_type<tc>, window_params = [{transform_indices = @transform_0, window_bounds = array<i64: 128, 16>}, {pipeline_mode = #tpu.pipeline_mode<synchronous>, transform_indices = @transform_1, window_bounds = array<i64: 32, 16>}, {pipeline_mode = #tpu.pipeline_mode<synchronous>, transform_indices = @transform_2, window_bounds = array<i64: 1, 32>}, {transform_indices = @transform_3, window_bounds = array<i64: 1, 128>}]} {
    %c0 = arith.constant 0 : index
    %c0_0 = arith.constant 0 : index
    %0 = vector.load %arg2[%c0, %c0_0] : memref<32x16xf32, #tpu.memory_space<vmem>>, vector<32x16xf32>
    %c0_1 = arith.constant 0 : index
    %c0_2 = arith.constant 0 : index
    %1 = vector.load %arg1[%c0_1, %c0_2] : memref<128x16xf32, #tpu.memory_space<vmem>>, vector<128x16xf32>
    %cst = arith.constant dense<0.000000e+00> : vector<32x128xf32>
    %2 = tpu.matmul %0, %1, %cst {dimension_numbers = #tpu.dot_dimension_numbers<[1], [1], [0], [0], [0, 0, 1, 0], [], []>} : vector<32x16xf32>, vector<128x16xf32>, vector<32x128xf32> -> vector<32x128xf32>
    %3 = math.tanh %2 : vector<32x128xf32>
    %c0_3 = arith.constant 0 : index
    %c0_4 = arith.constant 0 : index
    %4 = vector.load %arg3[%c0_3, %c0_4] : memref<1x32xf32, #tpu.memory_space<vmem>>, vector<1x32xf32>
    %cst_5 = arith.constant 0.176776692 : f32
    %5 = vector.broadcast %cst_5 : f32 to vector<1x32xf32>
    %6 = arith.mulf %4, %5 : vector<1x32xf32>
    %cst_6 = arith.constant dense<0.000000e+00> : vector<1x128xf32>
    %7 = tpu.matmul %6, %3, %cst_6 {dimension_numbers = #tpu.dot_dimension_numbers<[1], [0], [0], [1], [0, 0, 1, 1], [], []>} : vector<1x32xf32>, vector<32x128xf32>, vector<1x128xf32> -> vector<1x128xf32>
    %c0_7 = arith.constant 0 : index
    %c0_8 = arith.constant 0 : index
    %8 = vector.load %arg4[%c0_7, %c0_8] : memref<1x128xf32, #tpu.memory_space<vmem>>, vector<1x128xf32>
    tpu.vector_store %arg4[%c0_7, %c0_8], %7 {strides = array<i32>} : memref<1x128xf32, #tpu.memory_space<vmem>>, vector<1x128xf32>,
    return
  }
  func.func @transform_0(%arg0: i32) -> (i32, i32) {
    %c0_i32 = arith.constant 0 : i32
    %c0_i32_0 = arith.constant 0 : i32
    return %arg0, %c0_i32 : i32, i32
  }
  func.func @transform_1(%arg0: i32) -> (i32, i32) {
    %c0_i32 = arith.constant 0 : i32
    %c0_i32_0 = arith.constant 0 : i32
    %c0_i32_1 = arith.constant 0 : i32
    return %c0_i32, %c0_i32_0 : i32, i32
  }
  func.func @transform_2(%arg0: i32) -> (i32, i32) {
    %c0_i32 = arith.constant 0 : i32
    %c0_i32_0 = arith.constant 0 : i32
    %c0_i32_1 = arith.constant 0 : i32
    return %c0_i32, %c0_i32_0 : i32, i32
  }
  func.func @transform_3(%arg0: i32) -> (i32, i32) {
    %c0_i32 = arith.constant 0 : i32
    %c0_i32_0 = arith.constant 0 : i32
    return %c0_i32, %arg0 : i32, i32
  }
}

</mosaic_0001>

<bundles_post_ra>
// kernel: tpu_custom_call.1
= control target key start
LH: loop header
LB: loop body
LE: loop exit
PB: predicated region body
PF: predicated region fallthrough
CT: control target
= control target key end

     0   :  { %vm35_vm0 = vcmask 130048   ;;  %s399_s0 = inlined_call_operand.vmem [shape: f32[128,16], index: 0, kind: input, shape index: {}]   ;;  %s400_s1 = inlined_call_operand.vmem [shape: f32[32,16], index: 1, kind: input, shape index: {}]   ;;  %s401_s2 = inlined_call_operand.vmem [shape: f32[1,32], index: 2, kind: input, shape index: {}]   ;;  %s402_s3 = inlined_call_operand.hbm [shape: f32[1,128], index: 3, kind: output, shape index: {}]  }
   0x1   :  { %v34_v0 = vld [vmem:[%s399_s0 + $0x78] sm:$0xff]  ;;  %v33_v1 = vld [vmem:[%s399_s0 + $0x70] sm:$0xff] }
   0x2   :  { %194 = vmatpush.xpose.msk.msra.mxu3 %vm35_vm0, %v34_v0  ;;  %193 = vmatpush.xpose.msk.msra.mxu2 %vm35_vm0, %v34_v0 }
   0x3   :  { %172 = vmatpush.xpose.msk.msra.mxu0 %vm35_vm0, %v34_v0 }
   0x4   :  { %8 = vsyncpa [#allocation3], 0  ;;  %v32_v2 = vld [vmem:[%s399_s0 + $0x68] sm:$0xff]  ;;  %v31_v3 = vld [vmem:[%s399_s0 + $0x60] sm:$0xff]  ;;  %vm131_vm1 = vcmask 261120   ;;  %s163_s29 = sshll.u32 %s402_s3, 4  ;;  %s164_s29 = int_to_ptr.hbm [resolvable:$true] %s163_s29 }
   0x5   :  { %v30_v4 = vld [vmem:[%s399_s0 + $0x58] sm:$0xff]  ;;  %v29_v5 = vld [vmem:[%s399_s0 + $0x50] sm:$0xff]  ;;  %v28_v6 = vld [vmem:[%s399_s0 + $0x48] sm:$0xff] }
   0x6   :  { %196 = vmatpush.xpose.msk.msra.mxu3 %vm35_vm0, %v33_v1  ;;  %195 = vmatpush.xpose.msk.msra.mxu2 %vm35_vm0, %v33_v1  ;;  %v27_v7 = vld [vmem:[%s399_s0 + $0x40] sm:$0xff]  ;;  %v26_v8 = vld [vmem:[%s399_s0 + $0x38] sm:$0xff]  ;;  %v25_v9 = vld [vmem:[%s399_s0 + $0x30] sm:$0xff] }
   0x7   :  { %173 = vmatpush.xpose.msk.msra.mxu0 %vm35_vm0, %v33_v1  ;;  %v24_v10 = vld [vmem:[%s399_s0 + $0x28] sm:$0xff]  ;;  %v23_v11 = vld [vmem:[%s399_s0 + $0x20] sm:$0xff]  ;;  %v22_v12 = vld [vmem:[%s399_s0 + $0x18] sm:$0xff] }
   0x8   :  { %v21_v13 = vld [vmem:[%s399_s0 + $0x10] sm:$0xff]  ;;  %v20_v14 = vld [vmem:[%s399_s0 + $0x8] sm:$0xff]  ;;  %v19_v15 = vld [vmem:[%s399_s0] sm:$0xff] }
   0x9   :  { %v17_v16 = vld [vmem:[%s400_s1 + $0x10] sm:$0xff]  ;;  %v16_v17 = vld [vmem:[%s400_s1 + $0x8] sm:$0xff]  ;;  %v15_v18 = vld [vmem:[%s400_s1] sm:$0xff] }
   0xa   :  { %198 = vmatpush.xpose.msk.msra.mxu3 %vm35_vm0, %v32_v2  ;;  %197 = vmatpush.xpose.msk.msra.mxu2 %vm35_vm0, %v32_v2  ;;  %v18_v19 = vld [vmem:[%s400_s1 + $0x18] sm:$0xff]  ;;  %v129_v26 = vld [vmem:[%s401_s2] sm:$0x1]  ;;  %s260_s1 = smov [#allocation2]  }
   0xb   :  { %174 = vmatpush.xpose.msk.msra.mxu0 %vm35_vm0, %v32_v2  ;;  %v130_v29 = vmul.f32 0.17677669, %v129_v26  ;;  %s161_s26 = sshll.u32 %s260_s1, 4  ;;  %s162_s26 = int_to_ptr.vmem [resolvable:$true] %s161_s26 }
   0xe   :  { %200 = vmatpush.xpose.msk.msra.mxu3 %vm35_vm0, %v31_v3  ;;  %199 = vmatpush.xpose.msk.msra.mxu2 %vm35_vm0, %v31_v3 }
   0xf   :  { %175 = vmatpush.xpose.msk.msra.mxu0 %vm35_vm0, %v31_v3 }
  0x12   :  { %202 = vmatpush.xpose.msk.msra.mxu3 %vm35_vm0, %v30_v4  ;;  %201 = vmatpush.xpose.msk.msra.mxu2 %vm35_vm0, %v30_v4 }
  0x13   :  { %176 = vmatpush.xpose.msk.msra.mxu0 %vm35_vm0, %v30_v4 }
  0x16   :  { %204 = vmatpush.xpose.msk.msra.mxu3 %vm35_vm0, %v29_v5  ;;  %203 = vmatpush.xpose.msk.msra.mxu2 %vm35_vm0, %v29_v5 }
  0x17   :  { %177 = vmatpush.xpose.msk.msra.mxu0 %vm35_vm0, %v29_v5 }
  0x1a   :  { %206 = vmatpush.xpose.msk.msra.mxu3 %vm35_vm0, %v28_v6  ;;  %205 = vmatpush.xpose.msk.msra.mxu2 %vm35_vm0, %v28_v6 }
  0x1b   :  { %178 = vmatpush.xpose.msk.msra.mxu0 %vm35_vm0, %v28_v6 }
  0x1e   :  { %208 = vmatpush.xpose.msk.msra.mxu3 %vm35_vm0, %v27_v7  ;;  %207 = vmatpush.xpose.msk.msra.mxu2 %vm35_vm0, %v27_v7 }
  0x1f   :  { %179 = vmatpush.xpose.msk.msra.mxu0 %vm35_vm0, %v27_v7 }
  0x22   :  { %210 = vmatpush.xpose.msk.msra.mxu3 %vm35_vm0, %v26_v8  ;;  %209 = vmatpush.xpose.msk.msra.mxu2 %vm35_vm0, %v26_v8 }
  0x23   :  { %180 = vmatpush.xpose.msk.msra.mxu0 %vm35_vm0, %v26_v8 }
  0x26   :  { %212 = vmatpush.xpose.msk.msra.mxu3 %vm35_vm0, %v25_v9  ;;  %211 = vmatpush.xpose.msk.msra.mxu2 %vm35_vm0, %v25_v9 }
  0x27   :  { %181 = vmatpush.xpose.msk.msra.mxu0 %vm35_vm0, %v25_v9 }
  0x2a   :  { %214 = vmatpush.xpose.msk.msra.mxu3 %vm35_vm0, %v24_v10  ;;  %213 = vmatpush.xpose.msk.msra.mxu2 %vm35_vm0, %v24_v10 }
  0x2b   :  { %182 = vmatpush.xpose.msk.msra.mxu0 %vm35_vm0, %v24_v10 }
  0x2e   :  { %216 = vmatpush.xpose.msk.msra.mxu3 %vm35_vm0, %v23_v11  ;;  %215 = vmatpush.xpose.msk.msra.mxu2 %vm35_vm0, %v23_v11 }
  0x2f   :  { %183 = vmatpush.xpose.msk.msra.mxu0 %vm35_vm0, %v23_v11 }
  0x32   :  { %218 = vmatpush.xpose.msk.msra.mxu3 %vm35_vm0, %v22_v12  ;;  %217 = vmatpush.xpose.msk.msra.mxu2 %vm35_vm0, %v22_v12 }
  0x33   :  { %184 = vmatpush.xpose.msk.msra.mxu0 %vm35_vm0, %v22_v12 }
  0x36   :  { %220 = vmatpush.xpose.msk.msra.mxu3 %vm35_vm0, %v21_v13  ;;  %219 = vmatpush.xpose.msk.msra.mxu2 %vm35_vm0, %v21_v13 }
  0x37   :  { %185 = vmatpush.xpose.msk.msra.mxu0 %vm35_vm0, %v21_v13 }
  0x3a   :  { %222 = vmatpush.xpose.msk.msra.mxu3 %vm35_vm0, %v20_v14  ;;  %221 = vmatpush.xpose.msk.msra.mxu2 %vm35_vm0, %v20_v14 }
  0x3b   :  { %186 = vmatpush.xpose.msk.msra.mxu0 %vm35_vm0, %v20_v14 }
  0x3e   :  { %224 = vmatpush.xpose.msk.msra.mxu3 %vm35_vm0, %v19_v15  ;;  %223 = vmatpush.xpose.msk.msra.mxu2 %vm35_vm0, %v19_v15 }
  0x3f   :  { %187 = vmatpush.xpose.msk.msra.mxu0 %vm35_vm0, %v19_v15 }
  0x41   :  { %190 = vmatmul.msk.f32.vlgmr.msra.gmra.mxu3 %vm35_vm0, %v17_v16  ;;  %189 = vmatmul.msk.f32.vlgmr.msra.gmra.mxu2 %vm35_vm0, %v16_v17 }
  0x42   :  { %188 = vmatmul.msk.f32.vlgmr.msra.gmra.mxu0 %vm35_vm0, %v15_v18 }
  0x49   :  { %191 = vmatmul.msk.f32.gmra.mxu3 %vm35_vm0, %v18_v19 }
  0xbf   :  { %v113_v23 = vpop.f32.mrf.mxu0 }
  0xc4   :  { %v119_v20 = vpop.f32.mrf.mxu3  ;;  %v116_v22 = vpop.f32.mrf.mxu2 }
  0xcc   :  { %v122_v21 = vpop.f32.mrf.mxu3 }
  0xcd   :  { %226 = vtanh.f32 %v122_v21 }
  0xce   :  { %228 = vtanh.f32 %v119_v20 }
  0xcf   :  { %230 = vtanh.f32 %v116_v22 }
  0xd0   :  { %232 = vtanh.f32 %v113_v23 }
  0xd3   :  { %v227_v24 = vpop.eup %226 }
  0xd4   :  { %v229_v25 = vpop.eup %228  ;;  %147 = vmatpush.msra.mxu1 %v227_v24 }
  0xd5   :  { %v231_v27 = vpop.eup %230 }
  0xd6   :  { %148 = vmatpush.msra.mxu1 %v229_v25  ;;  %v233_v28 = vpop.eup %232 }
  0xd8   :  { %149 = vmatpush.msra.mxu1 %v231_v27 }
  0xda   :  { %150 = vmatpush.msra.mxu1 %v233_v28 }
  0xdb   :  { %192 = vmatmul.msk.f32.vlgmr.msra.gmra.mxu1 %vm131_vm1, %v130_v29 }
 0x158   :  { %v152_v30 = vpop.f32.mrf.mxu1 }
 0x159   :  { %155 = vst [vmem:[#allocation2] sm:$0x1] %v152_v30 }
 0x15a   :  { %166 = dma.vmem_to_hbm [thread:$0]  %s162_s26, 16, %s164_s29, [#allocation3]  }
 0x15b   :  { %258 = dma.done.wait [#allocation3], 16  }
 0x15c   :  { %259 = vsyncadd [#allocation3], 4294967280 }
 0x15d   :  { %171 = vsyncpa [#allocation3], 1 }

</bundles_post_ra>
